<compile_context>
chip_gen: v5e
topology: v5e:2x2
jax: 0.10.0
libtpu: 0.0.40
codegen_flags: <defaults>
</compile_context>

<pallas_src>
import jax
import jax.numpy as jnp
from jax.experimental import pallas as pl
from jax.experimental.pallas import tpu as pltpu


def _heads_kernel(x2_ref, x3_ref, x4_ref, ws_ref, wm_ref, wl_ref,
                  os_ref, om_ref, ol_ref):
    # Each x*_ref is (C_in, H*W) for one batch element (batch dim squeezed),
    # each w*_ref is (C_out, C_in).  W @ X -> (C_out, H*W), already NCHW-major,
    # lane-dense on the last axis.
    os_ref[...] = jnp.dot(
        ws_ref[...], x2_ref[...], preferred_element_type=jnp.float32
    ).astype(os_ref.dtype)
    om_ref[...] = jnp.dot(
        wm_ref[...], x3_ref[...], preferred_element_type=jnp.float32
    ).astype(om_ref.dtype)
    ol_ref[...] = jnp.dot(
        wl_ref[...], x4_ref[...], preferred_element_type=jnp.float32
    ).astype(ol_ref.dtype)


def detection_head_tiny_forward(x2, x3, x4, w_small, w_medium, w_large):
    """Three bias-free 1x1 convs (NCHW in / NCHW out) in one fused kernel.

    x2: (B, 64, H2, W2), x3: (B, 128, H3, W3), x4: (B, 256, H4, W4)
    w_*: (C_out, C_in, 1, 1) PyTorch conv weight layout.
    """
    B = x2.shape[0]
    c_out = w_small.shape[0]

    # Flatten spatial dims only -- contiguous reshape in NCHW, no data movement.
    def flat(x):
        b, c, h, w = x.shape
        return x.reshape(b, c, h * w), (h, w)

    x2f, hw2 = flat(x2)
    x3f, hw3 = flat(x3)
    x4f, hw4 = flat(x4)
    C2, P2 = x2f.shape[1], x2f.shape[2]
    C3, P3 = x3f.shape[1], x3f.shape[2]
    C4, P4 = x4f.shape[1], x4f.shape[2]

    ws = w_small.reshape(c_out, C2)
    wm = w_medium.reshape(c_out, C3)
    wl = w_large.reshape(c_out, C4)

    out_shapes = (
        jax.ShapeDtypeStruct((B, c_out, P2), x2.dtype),
        jax.ShapeDtypeStruct((B, c_out, P3), x3.dtype),
        jax.ShapeDtypeStruct((B, c_out, P4), x4.dtype),
    )

    o_s, o_m, o_l = pl.pallas_call(
        _heads_kernel,
        out_shape=out_shapes,
        grid_spec=pltpu.PrefetchScalarGridSpec(
            num_scalar_prefetch=0,
            grid=(B,),  # one grid step per batch element; all heads fused
            in_specs=[
                # Activations: one full (C_in, H*W) slab per batch element.
                pl.BlockSpec((None, C2, P2), lambda b: (b, 0, 0)),
                pl.BlockSpec((None, C3, P3), lambda b: (b, 0, 0)),
                pl.BlockSpec((None, C4, P4), lambda b: (b, 0, 0)),
                # Weights: whole tensor, constant block index across the grid.
                pl.BlockSpec((c_out, C2), lambda b: (0, 0)),
                pl.BlockSpec((c_out, C3), lambda b: (0, 0)),
                pl.BlockSpec((c_out, C4), lambda b: (0, 0)),
            ],
            out_specs=[
                pl.BlockSpec((None, c_out, P2), lambda b: (b, 0, 0)),
                pl.BlockSpec((None, c_out, P3), lambda b: (b, 0, 0)),
                pl.BlockSpec((None, c_out, P4), lambda b: (b, 0, 0)),
            ],
        ),
        compiler_params=pltpu.CompilerParams(
            # Toy-sized grid of B steps: keep it on one core ("arbitrary");
            # switch to "parallel" when scaling to real feature-map sizes.
            dimension_semantics=("arbitrary",),
        ),
    )(x2f, x3f, x4f, ws, wm, wl)

    # Free reshapes back to NCHW spatial layout.
    return [
        o_s.reshape(B, c_out, *hw2),
        o_m.reshape(B, c_out, *hw3),
        o_l.reshape(B, c_out, *hw4),
    ]


class DetectionHeadTinyPallas:
    """JAX/Pallas port of DetectionHeadTiny (three bias-free 1x1 conv heads)."""

    def __init__(self, num_classes, key):
        self.num_classes = num_classes
        c_out = 4 + 1 + num_classes
        k_s, k_m, k_l = jax.random.split(key, 3)
        # Deterministic synthetic weights in PyTorch conv layout (C_out, C_in, 1, 1),
        # scaled roughly like kaiming-uniform fan_in.
        self.w_small = (
            jax.random.normal(k_s, (c_out, 64, 1, 1), jnp.float32) * (1.0 / 64) ** 0.5
        )
        self.w_medium = (
            jax.random.normal(k_m, (c_out, 128, 1, 1), jnp.float32) * (1.0 / 128) ** 0.5
        )
        self.w_large = (
            jax.random.normal(k_l, (c_out, 256, 1, 1), jnp.float32) * (1.0 / 256) ** 0.5
        )

    def __call__(self, x2, x3, x4):
        return detection_head_tiny_forward(
            x2, x3, x4, self.w_small, self.w_medium, self.w_large
        )


if __name__ == "__main__":
    key = jax.random.PRNGKey(0)
    k_w, k2, k3, k4 = jax.random.split(key, 4)

    num_classes = 3  # -> 8 output channels per head
    head = DetectionHeadTinyPallas(num_classes, k_w)

    # Small synthetic feature pyramid (NCHW, like the PyTorch module expects).
    x2 = jax.random.normal(k2, (2, 64, 16, 16), jnp.float32)   # small scale
    x3 = jax.random.normal(k3, (2, 128, 8, 8), jnp.float32)    # medium scale
    x4 = jax.random.normal(k4, (2, 256, 4, 4), jnp.float32)    # large scale

    outs = head(x2, x3, x4)
    outs = jax.block_until_ready(outs)

    # Reference check against plain-JAX 1x1 conv (einsum over channels).
    def ref_conv(x, w):
        return jnp.einsum("bchw,oc->bohw", x, w.reshape(w.shape[0], w.shape[1]))

    refs = [
        ref_conv(x2, head.w_small),
        ref_conv(x3, head.w_medium),
        ref_conv(x4, head.w_large),
    ]
    for o, r in zip(outs, refs):
        assert o.shape == r.shape and o.dtype == r.dtype
        assert jnp.allclose(o, r, atol=1e-4, rtol=1e-4)

    print("KERNEL_OK")
</pallas_src>

<mosaic_0001>
module attributes {stable_mosaic.version = 11 : i64} {
  func.func @_heads_kernel(%arg0: i32, %arg1: memref<1x64x256xf32, #tpu.memory_space<vmem>>, %arg2: memref<1x128x64xf32, #tpu.memory_space<vmem>>, %arg3: memref<1x256x16xf32, #tpu.memory_space<vmem>>, %arg4: memref<8x64xf32, #tpu.memory_space<vmem>>, %arg5: memref<8x128xf32, #tpu.memory_space<vmem>>, %arg6: memref<8x256xf32, #tpu.memory_space<vmem>>, %arg7: memref<1x8x256xf32, #tpu.memory_space<vmem>>, %arg8: memref<1x8x64xf32, #tpu.memory_space<vmem>>, %arg9: memref<1x8x16xf32, #tpu.memory_space<vmem>>) attributes {dimension_semantics = [#tpu.dimension_semantics<arbitrary>], iteration_bounds = array<i64: 2>, scalar_prefetch = 0 : i64, scratch_operands = 0 : i64, tpu.core_type = #tpu.core_type<tc>, window_params = [{transform_indices = @transform_0, window_bounds = array<i64: 1, 64, 256>}, {transform_indices = @transform_1, window_bounds = array<i64: 1, 128, 64>}, {transform_indices = @transform_2, window_bounds = array<i64: 1, 256, 16>}, {pipeline_mode = #tpu.pipeline_mode<synchronous>, transform_indices = @transform_3, window_bounds = array<i64: 8, 64>}, {pipeline_mode = #tpu.pipeline_mode<synchronous>, transform_indices = @transform_4, window_bounds = array<i64: 8, 128>}, {pipeline_mode = #tpu.pipeline_mode<synchronous>, transform_indices = @transform_5, window_bounds = array<i64: 8, 256>}, {transform_indices = @transform_6, window_bounds = array<i64: 1, 8, 256>}, {transform_indices = @transform_7, window_bounds = array<i64: 1, 8, 64>}, {transform_indices = @transform_8, window_bounds = array<i64: 1, 8, 16>}]} {
    %c0 = arith.constant 0 : index
    %c0_0 = arith.constant 0 : index
    %0 = vector.load %arg4[%c0, %c0_0] : memref<8x64xf32, #tpu.memory_space<vmem>>, vector<8x64xf32>
    %c0_1 = arith.constant 0 : index
    %c0_2 = arith.constant 0 : index
    %c0_3 = arith.constant 0 : index
    %1 = vector.load %arg1[%c0_1, %c0_2, %c0_3] : memref<1x64x256xf32, #tpu.memory_space<vmem>>, vector<1x64x256xf32>
    %2 = vector.shape_cast %1 : vector<1x64x256xf32> to vector<64x256xf32>
    %cst = arith.constant dense<0.000000e+00> : vector<8x256xf32>
    %3 = tpu.matmul %0, %2, %cst {dimension_numbers = #tpu.dot_dimension_numbers<[1], [0], [0], [1], [0, 0, 1, 1], [], []>} : vector<8x64xf32>, vector<64x256xf32>, vector<8x256xf32> -> vector<8x256xf32>
    %c0_4 = arith.constant 0 : index
    %c0_5 = arith.constant 0 : index
    %c0_6 = arith.constant 0 : index
    %4 = vector.load %arg7[%c0_4, %c0_5, %c0_6] : memref<1x8x256xf32, #tpu.memory_space<vmem>>, vector<1x8x256xf32>
    %5 = vector.shape_cast %4 : vector<1x8x256xf32> to vector<8x256xf32>
    %6 = vector.shape_cast %3 : vector<8x256xf32> to vector<1x8x256xf32>
    tpu.vector_store %arg7[%c0_4, %c0_5, %c0_6], %6 {strides = array<i32>} : memref<1x8x256xf32, #tpu.memory_space<vmem>>, vector<1x8x256xf32>,
    %c0_7 = arith.constant 0 : index
    %c0_8 = arith.constant 0 : index
    %7 = vector.load %arg5[%c0_7, %c0_8] : memref<8x128xf32, #tpu.memory_space<vmem>>, vector<8x128xf32>
    %c0_9 = arith.constant 0 : index
    %c0_10 = arith.constant 0 : index
    %c0_11 = arith.constant 0 : index
    %8 = vector.load %arg2[%c0_9, %c0_10, %c0_11] : memref<1x128x64xf32, #tpu.memory_space<vmem>>, vector<1x128x64xf32>
    %9 = vector.shape_cast %8 : vector<1x128x64xf32> to vector<128x64xf32>
    %cst_12 = arith.constant dense<0.000000e+00> : vector<8x64xf32>
    %10 = tpu.matmul %7, %9, %cst_12 {dimension_numbers = #tpu.dot_dimension_numbers<[1], [0], [0], [1], [0, 0, 1, 1], [], []>} : vector<8x128xf32>, vector<128x64xf32>, vector<8x64xf32> -> vector<8x64xf32>
    %c0_13 = arith.constant 0 : index
    %c0_14 = arith.constant 0 : index
    %c0_15 = arith.constant 0 : index
    %11 = vector.load %arg8[%c0_13, %c0_14, %c0_15] : memref<1x8x64xf32, #tpu.memory_space<vmem>>, vector<1x8x64xf32>
    %12 = vector.shape_cast %11 : vector<1x8x64xf32> to vector<8x64xf32>
    %13 = vector.shape_cast %10 : vector<8x64xf32> to vector<1x8x64xf32>
    tpu.vector_store %arg8[%c0_13, %c0_14, %c0_15], %13 {strides = array<i32>} : memref<1x8x64xf32, #tpu.memory_space<vmem>>, vector<1x8x64xf32>,
    %c0_16 = arith.constant 0 : index
    %c0_17 = arith.constant 0 : index
    %14 = vector.load %arg6[%c0_16, %c0_17] : memref<8x256xf32, #tpu.memory_space<vmem>>, vector<8x256xf32>
    %c0_18 = arith.constant 0 : index
    %c0_19 = arith.constant 0 : index
    %c0_20 = arith.constant 0 : index
    %15 = vector.load %arg3[%c0_18, %c0_19, %c0_20] : memref<1x256x16xf32, #tpu.memory_space<vmem>>, vector<1x256x16xf32>
    %16 = vector.shape_cast %15 : vector<1x256x16xf32> to vector<256x16xf32>
    %cst_21 = arith.constant dense<0.000000e+00> : vector<8x16xf32>
    %17 = tpu.matmul %14, %16, %cst_21 {dimension_numbers = #tpu.dot_dimension_numbers<[1], [0], [0], [1], [0, 0, 1, 1], [], []>} : vector<8x256xf32>, vector<256x16xf32>, vector<8x16xf32> -> vector<8x16xf32>
    %c0_22 = arith.constant 0 : index
    %c0_23 = arith.constant 0 : index
    %c0_24 = arith.constant 0 : index
    %18 = vector.load %arg9[%c0_22, %c0_23, %c0_24] : memref<1x8x16xf32, #tpu.memory_space<vmem>>, vector<1x8x16xf32>
    %19 = vector.shape_cast %18 : vector<1x8x16xf32> to vector<8x16xf32>
    %20 = vector.shape_cast %17 : vector<8x16xf32> to vector<1x8x16xf32>
    tpu.vector_store %arg9[%c0_22, %c0_23, %c0_24], %20 {strides = array<i32>} : memref<1x8x16xf32, #tpu.memory_space<vmem>>, vector<1x8x16xf32>,
    return
  }
  func.func @transform_0(%arg0: i32) -> (i32, i32, i32) {
    %c0_i32 = arith.constant 0 : i32
    %c0_i32_0 = arith.constant 0 : i32
    %c0_i32_1 = arith.constant 0 : i32
    return %arg0, %c0_i32, %c0_i32_0 : i32, i32, i32
  }
  func.func @transform_1(%arg0: i32) -> (i32, i32, i32) {
    %c0_i32 = arith.constant 0 : i32
    %c0_i32_0 = arith.constant 0 : i32
    %c0_i32_1 = arith.constant 0 : i32
    return %arg0, %c0_i32, %c0_i32_0 : i32, i32, i32
  }
  func.func @transform_2(%arg0: i32) -> (i32, i32, i32) {
    %c0_i32 = arith.constant 0 : i32
    %c0_i32_0 = arith.constant 0 : i32
    %c0_i32_1 = arith.constant 0 : i32
    return %arg0, %c0_i32, %c0_i32_0 : i32, i32, i32
  }
  func.func @transform_3(%arg0: i32) -> (i32, i32) {
    %c0_i32 = arith.constant 0 : i32
    %c0_i32_0 = arith.constant 0 : i32
    %c0_i32_1 = arith.constant 0 : i32
    return %c0_i32, %c0_i32_0 : i32, i32
  }
  func.func @transform_4(%arg0: i32) -> (i32, i32) {
    %c0_i32 = arith.constant 0 : i32
    %c0_i32_0 = arith.constant 0 : i32
    %c0_i32_1 = arith.constant 0 : i32
    return %c0_i32, %c0_i32_0 : i32, i32
  }
  func.func @transform_5(%arg0: i32) -> (i32, i32) {
    %c0_i32 = arith.constant 0 : i32
    %c0_i32_0 = arith.constant 0 : i32
    %c0_i32_1 = arith.constant 0 : i32
    return %c0_i32, %c0_i32_0 : i32, i32
  }
  func.func @transform_6(%arg0: i32) -> (i32, i32, i32) {
    %c0_i32 = arith.constant 0 : i32
    %c0_i32_0 = arith.constant 0 : i32
    %c0_i32_1 = arith.constant 0 : i32
    return %arg0, %c0_i32, %c0_i32_0 : i32, i32, i32
  }
  func.func @transform_7(%arg0: i32) -> (i32, i32, i32) {
    %c0_i32 = arith.constant 0 : i32
    %c0_i32_0 = arith.constant 0 : i32
    %c0_i32_1 = arith.constant 0 : i32
    return %arg0, %c0_i32, %c0_i32_0 : i32, i32, i32
  }
  func.func @transform_8(%arg0: i32) -> (i32, i32, i32) {
    %c0_i32 = arith.constant 0 : i32
    %c0_i32_0 = arith.constant 0 : i32
    %c0_i32_1 = arith.constant 0 : i32
    return %arg0, %c0_i32, %c0_i32_0 : i32, i32, i32
  }
}

</mosaic_0001>

<bundles_post_ra>
// kernel: tpu_custom_call.1
= control target key start
LH: loop header
LB: loop body
LE: loop exit
PB: predicated region body
PF: predicated region fallthrough
CT: control target
= control target key end

     0   :  { %s1227_s0 = inlined_call_operand.vmem [shape: f32[2,64,256], index: 0, kind: input, shape index: {}]   ;;  %s1228_s1 = inlined_call_operand.vmem [shape: f32[2,128,64], index: 1, kind: input, shape index: {}]   ;;  %s1229_s2 = inlined_call_operand.vmem [shape: f32[2,256,16], index: 2, kind: input, shape index: {}]   ;;  %s1230_s3 = inlined_call_operand.vmem [shape: f32[8,64], index: 3, kind: input, shape index: {}]   ;;  %s1231_s4 = inlined_call_operand.vmem [shape: f32[8,128], index: 4, kind: input, shape index: {}]   ;;  %s1232_s5 = inlined_call_operand.vmem [shape: f32[8,256], index: 5, kind: input, shape index: {}]   ;;  %s1233_s6 = inlined_call_operand.hbm [shape: f32[2,8,256], index: 6, kind: output, shape index: {0}]   ;;  %s1234_s7 = inlined_call_operand.hbm [shape: f32[2,8,64], index: 7, kind: output, shape index: {1}]   ;;  %s1235_s8 = inlined_call_operand.hbm [shape: f32[2,8,16], index: 8, kind: output, shape index: {2}]  }
   0x1   :  { %1238 = sst [smem:[#allocation11_spill]] %s1227_s0 }
   0x2   :  { %1239 = sst [smem:[#allocation12_spill]] %s1228_s1 }
   0x3   :  { %1240 = sst [smem:[#allocation13_spill]] %s1229_s2 }
   0x4   :  { %1241 = sst [smem:[#allocation14_spill]] %s1230_s3 }
   0x5   :  { %1242 = sst [smem:[#allocation15_spill]] %s1231_s4 }
   0x6   :  { %1243 = sst [smem:[#allocation16_spill]] %s1232_s5 }
   0x7   :  { %14 = vsyncpa [#allocation3], 0 }
   0x8   :  { %16 = vsyncpa [#allocation3 + $0x1], 0 }
   0x9   :  { %17 = vsyncpa [#allocation5], 0 }
   0xa   :  { %19 = vsyncpa [#allocation5 + $0x1], 0  ;;  %s986_s27 = smov 0   ;;  %s988_s28 = smov 0  }
   0xb   :  { %s990_s29 = smov 0   ;;  %s992_s30 = smov 0  }
   0xc LB: > { %1244 = sst [smem:[#allocation9_spill]] %s935_s29  ;;  %s1007_s9 = sadd.s32 4294967295, %s939_s30   ;;  %s939_s30 = sphi %s992_s30, %s1259_s30   ;;  %s935_s29 = sphi %s990_s29, %s1256_s29   ;;  %s931_s28 = sphi %s988_s28, %s1258_s28   ;;  %s927_s27 = sphi %s986_s27, %s1257_s27  }
   0xd   : > { %s1236_s10 = sadd.s32 4294967294, %s939_s30   ;;  %s1011_s11 = sadd.s32 1, %s939_s30  }
   0xe   : > { %s173_s12 = sadd.s32 1, %s935_s29  ;;  %s170_s13 = ssub.s32 %s939_s30, %s1011_s11 }
   0xf   : > { %p183_p0 = scmp.ne.s32.totalorder %s935_s29, %s931_s28  ;;  %p171_p1 = scmp.eq.s32.totalorder %s170_s13, 0 }
  0x10   : > { %p184_p2 = scmp.eq.s32.totalorder %s1007_s9, 1  ;;  %p189_p3 = scmp.ne.s32.totalorder %s931_s28, %s927_s27 }
  0x11   : > { %p190_p4 = scmp.eq.s32.totalorder %s1236_s10, 1  ;;  %p743_p7 = scmp.ge.s32.totalorder %s939_s30, 1 }
  0x12   : > { %s1024_s14 = scalar_select %p171_p1, %s935_s29, %s173_s12  }
  0x13   : > { %p1026_p5 = por %p184_p2, %p183_p0  ;;  %p1030_p6 = por %p190_p4, %p189_p3 }
  0x14   : > { %1245 = sst [smem:[#allocation10_spill]] %s1024_s14  ;;  %p293_p8 = scmp.lt.s32.totalorder %s939_s30, 3 }
  0x16   : > { %p294_p9 = pnand %p743_p7, %p293_p8 }
  0x17   : > { %p347_p10 = scmp.lt.s32.totalorder (!%p294_p9), %s1007_s9, 1  ;;  %s1248_s2 = sld [smem:[#allocation13_spill]] (!%p294_p9) }
  0x18   : > { %297 = sbr.rel (%p294_p9) target bundleno = 225 (0xe1), region = 44  ;;  %s1249_s1 = sld [smem:[#allocation12_spill]] (!%p294_p9) }
  0x19   : > { %s1250_s0 = sld [smem:[#allocation11_spill]] (!%p294_p9)  ;;  %s1132_s26 = sand.u32 (!%p294_p9), 1, %s931_s28  }
  0x1a   : > { %s1251_s3 = sld [smem:[#allocation14_spill]] (!%p294_p9)  ;;  %s544_s24 = sand.u32 (!%p294_p9), 1, %s1007_s9  }
  0x1b   : > { %s1252_s5 = sld [smem:[#allocation16_spill]] (!%p294_p9) }
  0x1c   : > { %s1253_s4 = sld [smem:[#allocation15_spill]] (!%p294_p9) }
  0x1d   : > { %s348_s17 = scalar_select %p347_p10, %s1007_s9, 1  ;;  %vm379_vm0 = vcmask 523264   ;;  %vm537_vm1 = vcmask 130048  }
  0x1f   : > { %s766_s18 = sshll.u32 %s348_s17, 8  ;;  %s764_s19 = sshll.u32 %s348_s17, 7 }
  0x20   : > { %s1041_s22 = scalar_lea.vmem %s1248_s2, %s766_s18  ;;  %s1046_s25 = scalar_lea.vmem %s1249_s1, %s764_s19  ;;  %v362_v53 = vld [vmem:[%s1251_s3] sm:$0xff] }
  0x21   : > { %v480_v0 = vld [vmem:[%s1041_s22 + $0x78] sm:$0xff]  ;;  %v479_v2 = vld [vmem:[%s1041_s22 + $0x70] sm:$0xff]  ;;  %s1054_s13 = scalar_lea.vmem %s1250_s0, %s764_s19  ;;  %v478_v4 = vld [vmem:[%s1041_s22 + $0x68] sm:$0xff]  ;;  %s745_s18 = sshll.u32 %s1132_s26, 3 }
  0x22   : > { %v441_v1 = vld [vmem:[%s1046_s25 + $0x78] sm:$0xff]  ;;  %497 = vmatpush.msra.mxu3 %v480_v0  ;;  %v440_v3 = vld [vmem:[%s1046_s25 + $0x70] sm:$0xff]  ;;  %v439_v5 = vld [vmem:[%s1046_s25 + $0x68] sm:$0xff]  ;;  %s767_s19 = sshll.u32 %s1007_s9, 4  ;;  %s339_s3 = scalar_lea.vmem [#allocation4], %s745_s18 }
  0x23   : > { %442 = vmatpush.msra.mxu2 %v441_v1  ;;  %v496_v6 = vld [vmem:[%s1041_s22 + $0xf8] sm:$0xff]  ;;  %v495_v7 = vld [vmem:[%s1041_s22 + $0xf0] sm:$0xff]  ;;  %v477_v9 = vld [vmem:[%s1041_s22 + $0x60] sm:$0xff]  ;;  %s1154_s29 = scalar_lea.vmem [#allocation6], %s745_s18  ;;  %s1165_s0 = scalar_lea.sflag [#allocation5], %s544_s24 }
  0x24   : > { %498 = vmatpush.msra.mxu3 %v479_v2  ;;  %v377_v8 = vld [vmem:[%s1054_s13 + $0x70] sm:$0xff]  ;;  %517 = vmatpush.msra.mxu0 %v496_v6  ;;  %v438_v10 = vld [vmem:[%s1046_s25 + $0x60] sm:$0xff]  ;;  %v494_v11 = vld [vmem:[%s1041_s22 + $0xe8] sm:$0xff]  ;;  %s591_s20 = sshll.u32 %s1154_s29, 4  ;;  %s837_s18 = scalar_lea.hbm %s1234_s7, 16  ;;  %s1160_s20 = int_to_ptr.vmem [resolvable:$true] %s591_s20 }
  0x25   : > { %443 = vmatpush.msra.mxu2 %v440_v3  ;;  %391 = vmatpush.msra.mxu1 %v377_v8  ;;  %v375_v12 = vld [vmem:[%s1054_s13 + $0x60] sm:$0xff]  ;;  %v476_v13 = vld [vmem:[%s1041_s22 + $0x58] sm:$0xff]  ;;  %v373_v15 = vld [vmem:[%s1054_s13 + $0x50] sm:$0xff] }
  0x26   : > { %499 = vmatpush.msra.mxu3 %v478_v4  ;;  %518 = vmatpush.msra.mxu0 %v495_v7  ;;  %v437_v14 = vld [vmem:[%s1046_s25 + $0x58] sm:$0xff]  ;;  %v493_v16 = vld [vmem:[%s1041_s22 + $0xe0] sm:$0xff]  ;;  %v475_v18 = vld [vmem:[%s1041_s22 + $0x50] sm:$0xff] }
  0x27   : > { %444 = vmatpush.msra.mxu2 %v439_v5  ;;  %392 = vmatpush.msra.mxu1 %v375_v12  ;;  %v371_v17 = vld [vmem:[%s1054_s13 + $0x40] sm:$0xff]  ;;  %v436_v19 = vld [vmem:[%s1046_s25 + $0x50] sm:$0xff]  ;;  %v492_v20 = vld [vmem:[%s1041_s22 + $0xd8] sm:$0xff] }
  0x28   : > { %500 = vmatpush.msra.mxu3 %v477_v9  ;;  %519 = vmatpush.msra.mxu0 %v494_v11  ;;  %v369_v21 = vld [vmem:[%s1054_s13 + $0x30] sm:$0xff]  ;;  %v474_v22 = vld [vmem:[%s1041_s22 + $0x48] sm:$0xff]  ;;  %v367_v25 = vld [vmem:[%s1054_s13 + $0x20] sm:$0xff] }
  0x29   : > { %445 = vmatpush.msra.mxu2 %v438_v10  ;;  %393 = vmatpush.msra.mxu1 %v373_v15  ;;  %v435_v23 = vld [vmem:[%s1046_s25 + $0x48] sm:$0xff]  ;;  %v491_v24 = vld [vmem:[%s1041_s22 + $0xd0] sm:$0xff]  ;;  %v473_v26 = vld [vmem:[%s1041_s22 + $0x40] sm:$0xff] }
  0x2a   : > { %501 = vmatpush.msra.mxu3 %v476_v13  ;;  %520 = vmatpush.msra.mxu0 %v493_v16  ;;  %v434_v27 = vld [vmem:[%s1046_s25 + $0x40] sm:$0xff]  ;;  %v490_v28 = vld [vmem:[%s1041_s22 + $0xc8] sm:$0xff]  ;;  %v365_v29 = vld [vmem:[%s1054_s13 + $0x10] sm:$0xff] }
  0x2b   : > { %446 = vmatpush.msra.mxu2 %v437_v14  ;;  %394 = vmatpush.msra.mxu1 %v371_v17  ;;  %v472_v30 = vld [vmem:[%s1041_s22 + $0x38] sm:$0xff]  ;;  %v489_v32 = vld [vmem:[%s1041_s22 + $0xc0] sm:$0xff]  ;;  %v471_v34 = vld [vmem:[%s1041_s22 + $0x30] sm:$0xff] }
  0x2c   : > { %502 = vmatpush.msra.mxu3 %v475_v18  ;;  %521 = vmatpush.msra.mxu0 %v492_v20  ;;  %v433_v31 = vld [vmem:[%s1046_s25 + $0x38] sm:$0xff]  ;;  %v363_v33 = vld [vmem:[%s1054_s13] sm:$0xff]  ;;  %v432_v35 = vld [vmem:[%s1046_s25 + $0x30] sm:$0xff] }
  0x2d   : > { %447 = vmatpush.msra.mxu2 %v436_v19  ;;  %395 = vmatpush.msra.mxu1 %v369_v21  ;;  %v488_v36 = vld [vmem:[%s1041_s22 + $0xb8] sm:$0xff]  ;;  %v470_v38 = vld [vmem:[%s1041_s22 + $0x28] sm:$0xff]  ;;  %v487_v40 = vld [vmem:[%s1041_s22 + $0xb0] sm:$0xff] }
  0x2e   : > { %503 = vmatpush.msra.mxu3 %v474_v22  ;;  %522 = vmatpush.msra.mxu0 %v491_v24  ;;  %v378_v37 = vld [vmem:[%s1054_s13 + $0x78] sm:$0xff]  ;;  %v431_v39 = vld [vmem:[%s1046_s25 + $0x28] sm:$0xff]  ;;  %v469_v42 = vld [vmem:[%s1041_s22 + $0x20] sm:$0xff] }
  0x2f   : > { %448 = vmatpush.msra.mxu2 %v435_v23  ;;  %396 = vmatpush.msra.mxu1 %v367_v25  ;;  %v376_v41 = vld [vmem:[%s1054_s13 + $0x68] sm:$0xff]  ;;  %v430_v43 = vld [vmem:[%s1046_s25 + $0x20] sm:$0xff]  ;;  %v374_v45 = vld [vmem:[%s1054_s13 + $0x58] sm:$0xff] }
  0x30   : > { %504 = vmatpush.msra.mxu3 %v473_v26  ;;  %523 = vmatpush.msra.mxu0 %v490_v28  ;;  %v486_v44 = vld [vmem:[%s1041_s22 + $0xa8] sm:$0xff]  ;;  %v468_v46 = vld [vmem:[%s1041_s22 + $0x18] sm:$0xff]  ;;  %v485_v48 = vld [vmem:[%s1041_s22 + $0xa0] sm:$0xff] }
  0x31   : > { %449 = vmatpush.msra.mxu2 %v434_v27  ;;  %397 = vmatpush.msra.mxu1 %v365_v29  ;;  %v429_v47 = vld [vmem:[%s1046_s25 + $0x18] sm:$0xff]  ;;  %v372_v49 = vld [vmem:[%s1054_s13 + $0x48] sm:$0xff]  ;;  %v467_v50 = vld [vmem:[%s1041_s22 + $0x10] sm:$0xff] }
  0x32   : > { %505 = vmatpush.msra.mxu3 %v472_v30  ;;  %524 = vmatpush.msra.mxu0 %v489_v32  ;;  %v428_v51 = vld [vmem:[%s1046_s25 + $0x10] sm:$0xff]  ;;  %v484_v52 = vld [vmem:[%s1041_s22 + $0x98] sm:$0xff]  ;;  %v466_v54 = vld [vmem:[%s1041_s22 + $0x8] sm:$0xff] }
  0x33   : > { %450 = vmatpush.msra.mxu2 %v433_v31  ;;  %398 = vmatpush.msra.mxu1 %v363_v33  ;;  %v427_v55 = vld [vmem:[%s1046_s25 + $0x8] sm:$0xff]  ;;  %v370_v56 = vld [vmem:[%s1054_s13 + $0x38] sm:$0xff]  ;;  %v483_v57 = vld [vmem:[%s1041_s22 + $0x90] sm:$0xff] }
  0x34   : > { %506 = vmatpush.msra.mxu3 %v471_v34  ;;  %525 = vmatpush.msra.mxu0 %v488_v36  ;;  %v465_v58 = vld [vmem:[%s1041_s22] sm:$0xff]  ;;  %v368_v62 = vld [vmem:[%s1054_s13 + $0x28] sm:$0xff]  ;;  %v366_v0 = vld [vmem:[%s1054_s13 + $0x18] sm:$0xff] }
  0x35   : > { %451 = vmatpush.msra.mxu2 %v432_v35  ;;  %411 = vmatpush.msrb.mxu1 %v378_v37  ;;  %v426_v59 = vld [vmem:[%s1046_s25] sm:$0xff]  ;;  %v482_v63 = vld [vmem:[%s1041_s22 + $0x88] sm:$0xff] }
  0x36   : > { %507 = vmatpush.msra.mxu3 %v470_v38  ;;  %526 = vmatpush.msra.mxu0 %v487_v40  ;;  %v463_v60 = vld [vmem:[%s1252_s5] sm:$0xff]  ;;  %v464_v2 = vld [vmem:[%s1252_s5 + $0x8] sm:$0xff] }
  0x37   : > { %452 = vmatpush.msra.mxu2 %v431_v39  ;;  %412 = vmatpush.msrb.mxu1 %v376_v41  ;;  %v425_v61 = vld [vmem:[%s1253_s4] sm:$0xff]  ;;  %v364_v3 = vld [vmem:[%s1054_s13 + $0x8] sm:$0xff]  ;;  %s760_s13 = sshll.u32 %s1007_s9, 3  ;;  %s577_s4 = sshll.u32 %s339_s3, 4  ;;  %s578_s4 = int_to_ptr.vmem [resolvable:$true] %s577_s4 }
  0x38   : > { %508 = vmatpush.msra.mxu3 %v469_v42  ;;  %527 = vmatpush.msra.mxu0 %v486_v44  ;;  %v481_v1 = vld [vmem:[%s1041_s22 + $0x80] sm:$0xff]  ;;  %s744_s22 = sshll.u32 %s1132_s26, 4  ;;  %s575_s23 = scalar_lea.hbm %s1234_s7, %s760_s13 }
  0x39   : > { %453 = vmatpush.msra.mxu2 %v430_v43  ;;  %413 = vmatpush.msrb.mxu1 %v374_v45  ;;  %s1135_s12 = scalar_lea.vmem [#allocation2], %s744_s22  ;;  %s561_s22 = scalar_lea.hbm %s1233_s6, %s767_s19 }
  0x3a   : > { %509 = vmatpush.msra.mxu3 %v468_v46  ;;  %528 = vmatpush.msra.mxu0 %v485_v48  ;;  %s563_s17 = sshll.u32 %s1135_s12, 4  ;;  %s589_s2 = scalar_lea.hbm %s1235_s8, %s760_s13  ;;  %s1142_s17 = int_to_ptr.vmem [resolvable:$true] %s563_s17 }
  0x3b   : > { %454 = vmatpush.msra.mxu2 %v429_v47  ;;  %414 = vmatpush.msrb.mxu1 %v372_v49  ;;  %s579_s5 = sshll.u32 %s575_s23, 4  ;;  %s565_s14 = sshll.u32 %s561_s22, 4  ;;  %s580_s5 = int_to_ptr.hbm [resolvable:$true] %s579_s5  ;;  %s1157_s14 = int_to_ptr.hbm [resolvable:$true] %s565_s14 }
  0x3c   : > { %510 = vmatpush.msra.mxu3 %v467_v50  ;;  %529 = vmatpush.msra.mxu0 %v484_v52  ;;  %s593_s21 = sshll.u32 %s589_s2, 4  ;;  %s831_s1 = sshra.s32 %s580_s5, 4  ;;  %s1162_s21 = int_to_ptr.hbm [resolvable:$true] %s593_s21  ;;  %s832_s1 = int_to_ptr.hbm [resolvable:$true] %s831_s1 }
  0x3d   : > { %455 = vmatpush.msra.mxu2 %v428_v51  ;;  %753 = vmatmul.msk.f32.vlgmr.msra.gmra.mxu1 %vm379_vm0, %v362_v53  ;;  %s833_s2 = scalar_lea.hbm %s832_s1, 8  ;;  %p838_p0 = scmp.lt.s32.totalorder %s832_s1, %s1234_s7 }
  0x3e   : > { %511 = vmatpush.msra.mxu3 %v466_v54  ;;  %415 = vmatpush.msrb.mxu1 %v370_v56  ;;  %p834_p11 = scmp.ne.s32.totalorder %s832_s1, %s833_s2  ;;  %p839_p1 = scmp.lt.s32.totalorder %s837_s18, %s833_s2 }
  0x3f   : > { %456 = vmatpush.msra.mxu2 %v427_v55  ;;  %530 = vmatpush.msra.mxu0 %v483_v57 }
  0x40   : > { %512 = vmatpush.msra.mxu3 %v465_v58  ;;  %416 = vmatpush.msrb.mxu1 %v368_v62  ;;  %p835_p12 = pnand %p834_p11, %p1026_p5  ;;  %p840_p2 = por %p839_p1, %p838_p0 }
  0x41   : > { %457 = vmatpush.msra.mxu2 %v426_v59  ;;  %513 = vmatmul.f32.vlgmr.msra.gmra.mxu3 %v463_v60 }
  0x42   : > { %458 = vmatmul.f32.vlgmr.msra.gmra.mxu2 %v425_v61  ;;  %531 = vmatpush.msra.mxu0 %v482_v63  ;;  %p836_p13 = pneg %p835_p12 }
  0x43   : > { %417 = vmatpush.msrb.mxu1 %v366_v0 }
  0x44   : > { %532 = vmatpush.msra.mxu0 %v481_v1  ;;  %p841_p3 = pnand %p840_p2, %p836_p13 }
  0x45   : > { %533 = vmatmul.f32.vlgmr.msra.gmra.mxu0 %v464_v2  ;;  %418 = vmatpush.msrb.mxu1 %v364_v3 }
  0x46   : > { %754 = vmatmul.msk.f32.vlgmr.msrb.gmra.mxu1 %vm379_vm0, %v362_v53 }
  0xba   : > { %v400_v4 = vpop.f32.mrf.mxu1 }
  0xbb   : > { %423 = vst [vmem:[%s1135_s12] sm:$0xff] %v400_v4 }
  0xc2   : > { %v534_v5 = vpop.f32.mrf.mxu0 }
  0xc3   : > { %v420_v9 = vpop.f32.mrf.mxu1 }
  0xc4   : > { %v514_v6 = vpop.f32.mrf.mxu3  ;;  %424 = vst [vmem:[%s1135_s12 + $0x8] sm:$0xff] %v420_v9 }
  0xc5   : > { %v459_v7 = vpop.f32.mrf.mxu2  ;;  %v535_v8 = vadd.f32 %v534_v5, %v514_v6 }
  0xc6   : > { %462 = vst.msk [vmem:[%s339_s3] sm:$0xff] %vm379_vm0, %v459_v7 }
  0xc7   : > { %844 = shalt.err (!%p841_p3)
}
  0xc8   : > { %769 = dma.vmem_to_hbm [thread:$0]  (%p1026_p5), %s578_s4, 128, %s580_s5, %s1165_s0   ;;  %538 = vst.msk [vmem:[%s1154_s29] sm:$0xff] %vm537_vm1, %v535_v8 }
  0xc9   : > { %s540_s12 = scalar_lea.sflag [#allocation3], %s1132_s26  ;;  %s859_s19 = sshra.s32 %s1157_s14, 4  ;;  %s860_s19 = int_to_ptr.hbm [resolvable:$true] %s859_s19 }
  0xca   : > { %s861_s23 = scalar_lea.hbm %s860_s19, 16  ;;  %s865_s22 = scalar_lea.hbm %s1233_s6, 32 }
  0xcb   : > { %p862_p4 = scmp.ne.s32.totalorder %s860_s19, %s861_s23  ;;  %p866_p9 = scmp.lt.s32.totalorder %s860_s19, %s1233_s6 }
  0xcc   : > { %p867_p10 = scmp.lt.s32.totalorder %s865_s22, %s861_s23 }
  0xcd   : > { %p863_p7 = pnand %p862_p4, %p1026_p5 }
  0xce   : > { %p868_p11 = por %p867_p10, %p866_p9 }
  0xcf   : > { %p864_p8 = pneg %p863_p7 }
  0xd1   : > { %p869_p12 = pnand %p868_p11, %p864_p8 }
  0xd3   : > { %872 = shalt.err (!%p869_p12)
}
  0xd4   : > { %768 = dma.vmem_to_hbm [thread:$0]  (%p1026_p5), %s1142_s17, 256, %s1157_s14, %s540_s12  }
  0xd5   : > { %s887_s4 = sshra.s32 %s1162_s21, 4  ;;  %s893_s9 = scalar_lea.hbm %s1235_s8, 16  ;;  %s888_s4 = int_to_ptr.hbm [resolvable:$true] %s887_s4 }
  0xd6   : > { %s889_s5 = scalar_lea.hbm %s888_s4, 8  ;;  %p894_p2 = scmp.lt.s32.totalorder %s888_s4, %s1235_s8 }
  0xd7   : > { %p890_p13 = scmp.ne.s32.totalorder %s888_s4, %s889_s5  ;;  %p895_p3 = scmp.lt.s32.totalorder %s893_s9, %s889_s5 }
  0xd9   : > { %p891_p0 = pnand %p890_p13, %p1026_p5  ;;  %p896_p4 = por %p895_p3, %p894_p2 }
  0xdb   : > { %p892_p1 = pneg %p891_p0 }
  0xdd   : > { %p897_p7 = pnand %p896_p4, %p892_p1 }
  0xdf   : > { %900 = shalt.err (!%p897_p7)
}
  0xe0   : > { %770 = dma.vmem_to_hbm [thread:$0]  (%p1026_p5), %s1160_s20, 128, %s1162_s21, %s1165_s0  }
  0xe1 PF: > { %p784_p8 = scmp.ge.s32.totalorder %s939_s30, 2  ;;  %s605_s14 = sand.u32 1, %s927_s27  }
  0xe2   : > { %s606_s17 = scalar_lea.sflag [#allocation3], %s605_s14 }
  0xe3   : > { %p775_p9 = pnand %p784_p8, %p1030_p6 }
  0xe5   : > { %p776_p10 = pneg %p775_p9 }
  0xe7   : > { %918 = dma.done.wait (%p776_p10), %s606_s17, 256  }
  0xe8   : > { %920 = vsyncadd (%p776_p10), %s606_s17, 4294967040  ;;  %s1254_s3 = sadd.s32 4294967294, %s939_s30  }
  0xe9   : > { %s615_s13 = sand.u32 1, %s1254_s3  }
  0xea   : > { %s616_s15 = scalar_lea.sflag [#allocation5], %s615_s13 }
  0xeb   : > { %922 = dma.done.wait (%p776_p10), %s616_s15, 256  }
  0xec   : > { %924 = vsyncadd (%p776_p10), %s616_s15, 4294967040  ;;  %s1255_s20 = sld [smem:[#allocation9_spill]]  ;;  %p22_p5 = scmp.ge.s32.totalorder %s1011_s11, 4  }
  0xed   : > { %s1256_s29 = sld [smem:[#allocation10_spill]]  ;;  %s1257_s27 = smov %s931_s28 }
  0xee   : > { %s1259_s30 = smov %s1011_s11  ;;  %24 = sbr.rel (!%p22_p5) target bundleno = 12 (0xc), region = 117 }
  0xf2   : > { %s1258_s28 = smov %s1255_s20 }
  0xf3   :  { %632 = vsyncpa [#allocation3], 1 }
  0xf4   :  { %634 = vsyncpa [#allocation3 + $0x1], 1 }
  0xf5   :  { %635 = vsyncpa [#allocation5], 1 }
  0xf6   :  { %637 = vsyncpa [#allocation5 + $0x1], 1 }

</bundles_post_ra>
